<compile_context>
chip_gen: v7x
topology: tpu7x:2x2x1
jax: 0.10.0
libtpu: 0.0.40
codegen_flags: <defaults>
</compile_context>

<pallas_src>
import functools

import jax
import jax.numpy as jnp
import numpy as np
from jax.experimental import pallas as pl
from jax.experimental.pallas import tpu as pltpu


def _gat_kernel(x_ref, w_ref, aexp_ref, adj_ref, out_ref, *, hc):
    # x_ref   : (N, Fin)   node features                     (grid-invariant)
    # w_ref   : (Fin, HC)  fused per-head projection weights (grid-invariant)
    # aexp_ref: (HC, HC)   block-diag a_src, replicated over each head's C lanes
    # adj_ref : (TM, N)    int8 edge multiplicities for this dst-row block
    # out_ref : (TM, HC)   lane-dense output slab for this dst-row block
    f32 = jnp.float32
    bf16 = jnp.bfloat16

    # Fused projection for ALL source nodes.  Every dst block needs all source
    # features; recomputing it per grid step is cheap next to the O(TM*N*HC)
    # attention matmul and keeps the dst axis safe for megacore "parallel".
    xp = jnp.dot(x_ref[...].astype(bf16), w_ref[...].astype(bf16),
                 preferred_element_type=f32)                      # (N, HC) f32

    # alpha[n, h*C + c] == alpha_src[n, h]: one MXU matmul against the
    # block-diagonal expansion of a_src replaces the VPU multiply +
    # cross-lane sum (and leaves the head score replicated across its C lanes).
    alpha = jnp.dot(xp.astype(bf16), aexp_ref[...].astype(bf16),
                    preferred_element_type=f32)                   # (N, HC) f32

    # No LeakyReLU in the module => alpha_dst cancels out of the row softmax,
    # and a per-head (per-lane) global max is an exact, safe shift.
    m = jnp.max(alpha, axis=0, keepdims=True)                     # (1, HC)
    exp_w = jnp.exp(alpha - m)                                    # (N, HC), in (0, 1]

    # Softmax numerator and denominator for every head/channel with ONE fused
    # lane-dense MXU matmul against the adjacency strip.  Non-edges contribute
    # 0 via adj == 0; duplicate edges are weighted by their multiplicity,
    # matching the reference scatter-add semantics.
    rhs = jnp.concatenate([(exp_w * xp).astype(bf16),
                           exp_w.astype(bf16)], axis=1)           # (N, 2*HC) bf16
    adj = adj_ref[...].astype(bf16)                               # (TM, N)
    numden = jnp.dot(adj, rhs, preferred_element_type=f32)        # (TM, 2*HC) f32

    num = numden[:, :hc]
    den = numden[:, hc:]
    out = num * pl.reciprocal(den + jnp.float32(1e-16), approx=True)
    out_ref[...] = out.astype(out_ref.dtype)


def my_gat_layer_forward(x, W, a_src, a_dst, edge_index, heads, out_channels,
                         block_rows=64):
    """Forward pass of MyGATLayer (eval mode) as a single fused Pallas kernel."""
    # a_dst cancels exactly in the softmax because the module applies no
    # LeakyReLU before it (accepted only for signature parity with the module).
    del a_dst
    N, fin = x.shape
    H, C = heads, out_channels
    HC = H * C

    # Block-diagonal expansion of a_src: a_exp[h*C + c', g*C + c] =
    # a_src[h, c'] if h == g else 0, so xp @ a_exp replicates each head's
    # attention score across that head's C output lanes.
    head_eye = jnp.eye(H, dtype=a_src.dtype)
    a_exp = jnp.broadcast_to(
        a_src[:, :, None, None] * head_eye[:, None, :, None],
        (H, C, H, C)).reshape(HC, HC)

    # Densify the edge list: adj[dst, src] = edge multiplicity, stored int8
    # (quarters HBM/VMEM traffic vs f32; multiplicities assumed < 128).
    row, col = edge_index
    adj = jnp.zeros((N, N), jnp.int32).at[col, row].add(1).astype(jnp.int8)

    # Destination-row tiling (each grid step owns TM dst rows).
    tm = block_rows if (N % block_rows == 0) else N
    grid = (N // tm,)

    kernel = functools.partial(_gat_kernel, hc=HC)
    out = pl.pallas_call(
        kernel,
        out_shape=jax.ShapeDtypeStruct((N, HC), x.dtype),
        grid_spec=pltpu.PrefetchScalarGridSpec(
            num_scalar_prefetch=0,
            grid=grid,
            in_specs=[
                pl.BlockSpec((N, fin), lambda i: (0, 0)),    # x       (invariant)
                pl.BlockSpec((fin, HC), lambda i: (0, 0)),   # W       (invariant)
                pl.BlockSpec((HC, HC), lambda i: (0, 0)),    # a_exp   (invariant)
                pl.BlockSpec((tm, N), lambda i: (i, 0)),     # adj dst-row strip
            ],
            out_specs=pl.BlockSpec((tm, HC), lambda i: (i, 0)),
        ),
        compiler_params=pltpu.CompilerParams(
            # dst-row blocks are independent -> shard across TensorCores (v7x).
            dimension_semantics=("parallel",)),
    )(x, W, a_exp, adj)

    # F.dropout(p=0.6) is identity in eval mode.
    # TODO(synk): training-mode dropout not implemented (inference semantics only).
    return out


def reference_forward(x, W, a_src, a_dst, edge_index, heads, out_channels):
    """Pure-JAX segment-softmax reference mirroring the PyTorch module."""
    N = x.shape[0]
    H, C = heads, out_channels
    xp = (x @ W).reshape(N, H, C)
    alpha_src = jnp.sum(xp * a_src[None], axis=2)            # (N, H)
    alpha_dst = jnp.sum(xp * a_dst[None], axis=2)            # (N, H)
    row, col = edge_index
    e = alpha_src[row] + alpha_dst[col]                      # (E, H)
    m = jax.ops.segment_max(e, col, num_segments=N)
    e_exp = jnp.exp(e - m[col])
    s = jax.ops.segment_sum(e_exp, col, num_segments=N)
    att = e_exp / (s[col] + 1e-16)
    out = jnp.zeros((N, H, C), x.dtype).at[col].add(att[:, :, None] * xp[row])
    return out.reshape(N, H * C)


if __name__ == "__main__":
    # Small but (8,128)-friendly shapes: N=128 nodes, F_in=32, heads=8 (module
    # default), C_out=16 -> H*C = 128 lane-dense output; E=512 random edges.
    N, F_IN, HEADS, C_OUT, E = 128, 32, 8, 16, 512
    key = jax.random.PRNGKey(0)
    k1, k2, k3, k4, k5, k6 = jax.random.split(key, 6)

    x = jax.random.normal(k1, (N, F_IN), jnp.float32)

    # Xavier-uniform style deterministic init (shapes from module __init__).
    bw = float(np.sqrt(6.0 / (F_IN + HEADS * C_OUT)))
    W = jax.random.uniform(k2, (F_IN, HEADS * C_OUT), jnp.float32, -bw, bw)
    ba = float(np.sqrt(6.0 / (HEADS + C_OUT)))
    a_src = jax.random.uniform(k3, (HEADS, C_OUT), jnp.float32, -ba, ba)
    a_dst = jax.random.uniform(k4, (HEADS, C_OUT), jnp.float32, -ba, ba)

    row = jax.random.randint(k5, (E,), 0, N)
    col = jax.random.randint(k6, (E,), 0, N)
    edge_index = jnp.stack([row, col])                       # (2, E)

    out = my_gat_layer_forward(x, W, a_src, a_dst, edge_index, HEADS, C_OUT)
    out = jax.block_until_ready(out)

    ref = reference_forward(x, W, a_src, a_dst, edge_index, HEADS, C_OUT)
    # Kernel feeds the MXU in bf16 (f32 accumulation), so allow ~1e-3-level
    # relative differences against the f32 reference.
    np.testing.assert_allclose(np.asarray(out), np.asarray(ref),
                               atol=3e-2, rtol=3e-2)
    print("KERNEL_OK")
</pallas_src>

<mosaic_0001>
module attributes {stable_mosaic.version = 11 : i64} {
  func.func @_gat_kernel(%arg0: i32, %arg1: memref<128x32xf32, #tpu.memory_space<vmem>>, %arg2: memref<32x128xf32, #tpu.memory_space<vmem>>, %arg3: memref<128x128xf32, #tpu.memory_space<vmem>>, %arg4: memref<64x128xi8, #tpu.memory_space<vmem>>, %arg5: memref<64x128xf32, #tpu.memory_space<vmem>>) attributes {dimension_semantics = [#tpu.dimension_semantics<parallel>], iteration_bounds = array<i64: 2>, scalar_prefetch = 0 : i64, scratch_operands = 0 : i64, tpu.core_type = #tpu.core_type<tc>, window_params = [{pipeline_mode = #tpu.pipeline_mode<synchronous>, transform_indices = @transform_0, window_bounds = array<i64: 128, 32>}, {pipeline_mode = #tpu.pipeline_mode<synchronous>, transform_indices = @transform_1, window_bounds = array<i64: 32, 128>}, {pipeline_mode = #tpu.pipeline_mode<synchronous>, transform_indices = @transform_2, window_bounds = array<i64: 128, 128>}, {transform_indices = @transform_3, window_bounds = array<i64: 64, 128>}, {transform_indices = @transform_4, window_bounds = array<i64: 64, 128>}]} {
    %c0 = arith.constant 0 : index
    %c0_0 = arith.constant 0 : index
    %0 = vector.load %arg1[%c0, %c0_0] : memref<128x32xf32, #tpu.memory_space<vmem>>, vector<128x32xf32>
    %1 = arith.truncf %0 : vector<128x32xf32> to vector<128x32xbf16>
    %c0_1 = arith.constant 0 : index
    %c0_2 = arith.constant 0 : index
    %2 = vector.load %arg2[%c0_1, %c0_2] : memref<32x128xf32, #tpu.memory_space<vmem>>, vector<32x128xf32>
    %3 = arith.truncf %2 : vector<32x128xf32> to vector<32x128xbf16>
    %cst = arith.constant dense<0.000000e+00> : vector<128x128xf32>
    %4 = tpu.matmul %1, %3, %cst {dimension_numbers = #tpu.dot_dimension_numbers<[1], [0], [0], [1], [0, 0, 1, 1], [], []>} : vector<128x32xbf16>, vector<32x128xbf16>, vector<128x128xf32> -> vector<128x128xf32>
    %5 = arith.truncf %4 : vector<128x128xf32> to vector<128x128xbf16>
    %c0_3 = arith.constant 0 : index
    %c0_4 = arith.constant 0 : index
    %6 = vector.load %arg3[%c0_3, %c0_4] : memref<128x128xf32, #tpu.memory_space<vmem>>, vector<128x128xf32>
    %7 = arith.truncf %6 : vector<128x128xf32> to vector<128x128xbf16>
    %cst_5 = arith.constant dense<0.000000e+00> : vector<128x128xf32>
    %8 = tpu.matmul %5, %7, %cst_5 {dimension_numbers = #tpu.dot_dimension_numbers<[1], [0], [0], [1], [0, 0, 1, 1], [], []>} : vector<128x128xbf16>, vector<128x128xbf16>, vector<128x128xf32> -> vector<128x128xf32>
    %cst_6 = arith.constant dense<0xFF800000> : vector<128xf32>
    %9 = vector.multi_reduction <maximumf>, %8, %cst_6 [0] : vector<128x128xf32> to vector<128xf32>
    %10 = vector.shape_cast %9 : vector<128xf32> to vector<1x128xf32>
    %11 = vector.broadcast %10 : vector<1x128xf32> to vector<128x128xf32>
    %12 = arith.subf %8, %11 : vector<128x128xf32>
    %13 = math.exp %12 : vector<128x128xf32>
    %14 = arith.mulf %13, %4 : vector<128x128xf32>
    %15 = arith.truncf %14 : vector<128x128xf32> to vector<128x128xbf16>
    %16 = arith.truncf %13 : vector<128x128xf32> to vector<128x128xbf16>
    %17 = tpu.concatenate %15, %16 in 1 : vector<128x128xbf16>, vector<128x128xbf16> -> vector<128x256xbf16>
    %c0_7 = arith.constant 0 : index
    %c0_8 = arith.constant 0 : index
    %18 = vector.load %arg4[%c0_7, %c0_8] : memref<64x128xi8, #tpu.memory_space<vmem>>, vector<64x128xi8>
    %19 = arith.sitofp %18 : vector<64x128xi8> to vector<64x128xbf16>
    %cst_9 = arith.constant dense<0.000000e+00> : vector<64x256xf32>
    %20 = tpu.matmul %19, %17, %cst_9 {dimension_numbers = #tpu.dot_dimension_numbers<[1], [0], [0], [1], [0, 0, 1, 1], [], []>} : vector<64x128xbf16>, vector<128x256xbf16>, vector<64x256xf32> -> vector<64x256xf32>
    %21 = vector.extract_strided_slice %20 {offsets = [0, 0], sizes = [64, 128], strides = [1, 1]} : vector<64x256xf32> to vector<64x128xf32>
    %22 = vector.extract_strided_slice %20 {offsets = [0, 128], sizes = [64, 128], strides = [1, 1]} : vector<64x256xf32> to vector<64x128xf32>
    %cst_10 = arith.constant 1.000000e-16 : f32
    %23 = vector.broadcast %cst_10 : f32 to vector<64x128xf32>
    %24 = arith.addf %22, %23 : vector<64x128xf32>
    %25 = tpu.reciprocal %24 {approx = true} : vector<64x128xf32> -> vector<64x128xf32>
    %26 = arith.mulf %21, %25 : vector<64x128xf32>
    %c0_11 = arith.constant 0 : index
    %c0_12 = arith.constant 0 : index
    %27 = vector.load %arg5[%c0_11, %c0_12] : memref<64x128xf32, #tpu.memory_space<vmem>>, vector<64x128xf32>
    tpu.vector_store %arg5[%c0_11, %c0_12], %26 {strides = array<i32>} : memref<64x128xf32, #tpu.memory_space<vmem>>, vector<64x128xf32>,
    return
  }
  func.func @transform_0(%arg0: i32) -> (i32, i32) {
    %c0_i32 = arith.constant 0 : i32
    %c0_i32_0 = arith.constant 0 : i32
    %c0_i32_1 = arith.constant 0 : i32
    return %c0_i32, %c0_i32_0 : i32, i32
  }
  func.func @transform_1(%arg0: i32) -> (i32, i32) {
    %c0_i32 = arith.constant 0 : i32
    %c0_i32_0 = arith.constant 0 : i32
    %c0_i32_1 = arith.constant 0 : i32
    return %c0_i32, %c0_i32_0 : i32, i32
  }
  func.func @transform_2(%arg0: i32) -> (i32, i32) {
    %c0_i32 = arith.constant 0 : i32
    %c0_i32_0 = arith.constant 0 : i32
    %c0_i32_1 = arith.constant 0 : i32
    return %c0_i32, %c0_i32_0 : i32, i32
  }
  func.func @transform_3(%arg0: i32) -> (i32, i32) {
    %c0_i32 = arith.constant 0 : i32
    %c0_i32_0 = arith.constant 0 : i32
    return %arg0, %c0_i32 : i32, i32
  }
  func.func @transform_4(%arg0: i32) -> (i32, i32) {
    %c0_i32 = arith.constant 0 : i32
    %c0_i32_0 = arith.constant 0 : i32
    return %arg0, %c0_i32 : i32, i32
  }
}

</mosaic_0001>

<bundles_post_ra>
// kernel: tpu_custom_call.1
= control target key start
LH: loop header
LB: loop body
LE: loop exit
PB: predicated region body
PF: predicated region fallthrough
CT: control target
= control target key end

     0   :  { %9 = vsyncpa [#allocation3], 0  ;;  %s1499_s0 = inlined_call_operand.vmem [shape: f32[128,32], index: 0, kind: input, shape index: {}]   ;;  %s1500_s1 = inlined_call_operand.vmem [shape: f32[32,128], index: 1, kind: input, shape index: {}]   ;;  %s1501_s2 = inlined_call_operand.vmem [shape: f32[128,128], index: 2, kind: input, shape index: {}]   ;;  %s1502_s3 = inlined_call_operand.hbm [shape: s8[128,128], index: 3, kind: input, shape index: {}]   ;;  %s1503_s4 = inlined_call_operand.hbm [shape: f32[128,128], index: 4, kind: output, shape index: {}]  }
   0x1   :  { %11 = vsyncpa [#allocation3 + $0x1], 0 }
   0x2   :  { %12 = vsyncpa [#allocation4], 0 }
   0x3   :  { %14 = vsyncpa [#allocation4 + $0x1], 0  ;;  %s1130_s15 = smov 0   ;;  %s1132_s16 = smov 0  }
   0x4   :  { %s1134_s17 = smov 0   ;;  %s1136_s18 = smov 0  }
   0x5 LB: > { %s1151_s19 = sadd.s32 4294967295, %s1096_s18   ;;  %s799_s20 = sadd.s32 4294967294, %s1096_s18   ;;  %s1096_s18 = sphi %s1136_s18, %s1516_s18   ;;  %s1092_s17 = sphi %s1134_s17, %s1515_s17   ;;  %s1088_s16 = sphi %s1132_s16, %s1514_s16   ;;  %s1084_s15 = sphi %s1130_s15, %s1513_s15  }
   0x6   : > { %s1155_s21 = sadd.s32 1, %s1096_s18   ;;  %s90_s22 = sadd.s32 1, %s1092_s17 }
   0x7   : > { %s87_s23 = ssub.s32 %s1096_s18, %s1155_s21  ;;  %p97_p0 = scmp.ne.s32.totalorder %s1092_s17, %s1088_s16 }
   0x8   : > { %p88_p1 = scmp.eq.s32.totalorder %s87_s23, 0  ;;  %p98_p2 = scmp.eq.s32.totalorder %s1096_s18, 0 }
   0x9   : > { %p103_p3 = scmp.ne.s32.totalorder %s1088_s16, %s1084_s15  ;;  %p104_p4 = scmp.eq.s32.totalorder %s1151_s19, 0 }
   0xa   : > { %s1167_s24 = scalar_select %p88_p1, %s1092_s17, %s90_s22  }
   0xb   : > { %p1169_p5 = por %p98_p2, %p97_p0  ;;  %p1173_p6 = por %p104_p4, %p103_p3 }
   0xc   : > { %p127_p7 = scmp.eq.s32.totalorder %s1151_s19, 1  ;;  %p133_p8 = scmp.eq.s32.totalorder %s799_s20, 1 }
   0xd   : > { %p913_p10 = scmp.lt.s32.totalorder %s1096_s18, 2  ;;  %s162_s29 = sand.u32 1, %s1092_s17  }
   0xe   : > { %p1180_p11 = por %p127_p7, %p97_p0  ;;  %p1184_p12 = por %p133_p8, %p103_p3 }
   0xf   : > { %s821_s30 = sshll.u32 %s1096_s18, 8  ;;  %s802_s5 = sshll.u32 %s162_s29, 4 }
  0x10   : > { %s1507_s27 = scalar_select %p1180_p11, 1, 0 }
  0x11   : > { %s1508_s28 = scalar_select %p1184_p12, 1, 0 }
  0x12   : > { %s1193_s8 = scalar_lea.hbm %s1502_s3, %s821_s30  ;;  %s166_s9 = scalar_lea.vmem [#allocation2], %s802_s5 }
  0x13   : > { %s173_s10 = sshll.u32 %s166_s9, 4  ;;  %p1197_p13 = pnand %p913_p10, %p1169_p5  ;;  %s1201_s10 = int_to_ptr.vmem [resolvable:$true] %s173_s10 }
  0x14   : > { %s1203_s12 = scalar_lea.sflag [#allocation3], %s162_s29  ;;  %s1000_s13 = scalar_lea.hbm %s1193_s8, 256 }
  0x15   : > { %p1001_p0 = scmp.ne.s32.totalorder %s1193_s8, %s1000_s13  ;;  %p1002_p1 = pneg %p1197_p13 }
  0x16   : > { %s1005_s22 = scalar_lea.hbm %s1502_s3, 512  ;;  %p1006_p4 = scmp.lt.u32.totalorder %s1193_s8, %s1502_s3 }
  0x17   : > { %p1003_p2 = pnand %p1002_p1, %p1001_p0  ;;  %p1007_p5 = scmp.lt.u32.totalorder %s1005_s22, %s1000_s13 }
  0x18   : > { %p1009_p8 = scmp.lt.u32.totalorder %s1000_s13, %s1193_s8 }
  0x19   : > { %p1004_p3 = pneg %p1003_p2  ;;  %p1008_p7 = por %p1007_p5, %p1006_p4 }
  0x1b   : > { %p1010_p10 = por %p1009_p8, %p1008_p7 }
  0x1d   : > { %p1011_p9 = pnand %p1010_p10, %p1004_p3 }
  0x1f   : > { %1014 = shalt.err (!%p1011_p9)
}
  0x20   : > { %s1015_s29 = scalar_lea.vmem %s1201_s10, 256  ;;  %s1098_s30 = smov [#allocation2]  }
  0x21   : > { %p1016_p0 = scmp.ne.s32.totalorder %s1201_s10, %s1015_s29  ;;  %s1020_s5 = sshll.u32 %s1098_s30, 4  ;;  %s1021_s5 = int_to_ptr.vmem [resolvable:$false] %s1020_s5 }
  0x22   : > { %s1022_s6 = scalar_lea.vmem %s1021_s5, 512  ;;  %p1023_p11 = scmp.lt.s32.totalorder %s1201_s10, %s1021_s5 }
  0x23   : > { %p1018_p2 = pnand %p1016_p0, %p1002_p1  ;;  %p1024_p4 = scmp.lt.s32.totalorder %s1022_s6, %s1015_s29 }
  0x25   : > { %p1019_p12 = pneg %p1018_p2  ;;  %p1025_p5 = por %p1024_p4, %p1023_p11 }
  0x27   : > { %p1026_p7 = pnand %p1025_p5, %p1019_p12 }
  0x29   : > { %1029 = shalt.err (!%p1026_p7)
}
  0x2a   : > { %s1099_s7 = smov 128   ;;  %s1100_s9 = smov 8  }
  0x2b   : > { %908 = dma.hbm_to_vmem [thread:$0]  (!%p1197_p13), %s1193_s8, 256, %s1201_s10, %s1203_s12, %s1099_s7, %s1099_s7, %s1100_s9  }
  0x2c   : > { %p805_p9 = scmp.ge.s32.totalorder %s1096_s18, 1  ;;  %p181_p1 = scmp.lt.s32.totalorder %s1096_s18, 3 }
  0x2e   : > { %p182_p3 = pnand %p805_p9, %p181_p1 }
  0x2f   : > { %s1234_s13 = sand.u32 (!%p182_p3), 1, %s1088_s16  }
  0x30   : > { %185 = sbr.rel (%p182_p3) target bundleno = 863 (0x35f), region = 36  ;;  %s806_s14 = sshll.u32 (!%p182_p3), %s1234_s13, 4 }
  0x31   : > { %s188_s20 = scalar_lea.sflag (!%p182_p3), [#allocation3], %s1234_s13  ;;  %s1238_s22 = scalar_lea.vmem (!%p182_p3), [#allocation2], %s806_s14 }
  0x37   : > { %1075 = dma.done.wait (%p1173_p6), %s188_s20, 256  }
  0x38   : > { %1077 = vsyncadd (%p1173_p6), %s188_s20, 4294967040  ;;  %v243_v0 = vld [vmem:[%s1500_s1] sm:$0xff]  ;;  %v244_v1 = vld [vmem:[%s1500_s1 + $0x8] sm:$0xff]  ;;  %vm249_vm0 = vcmask 261120   ;;  %s822_s14 = sshll.u32 %s1151_s19, 10  ;;  %s713_s12 = scalar_lea.sflag [#allocation4], %s1234_s13 }
  0x39   : > { %v245_v2 = vld [vmem:[%s1500_s1 + $0x10] sm:$0xff]  ;;  %v247_v3 = vpack.c.bf16 %v244_v1, %v243_v0  ;;  %v246_v4 = vld [vmem:[%s1500_s1 + $0x18] sm:$0xff]  ;;  %v219_v5 = vld [vmem:[%s1499_s0] sm:$0xff]  ;;  %s1451_s11 = scalar_lea.hbm %s1503_s4, %s822_s14  ;;  %p1510_p11 = scmp.ne.s32.totalorder %s1507_s27, 0 }
  0x3a   : > { %v220_v6 = vld [vmem:[%s1499_s0 + $0x8] sm:$0xff]  ;;  %v248_v7 = vpack.c.bf16 %v246_v4, %v245_v2  ;;  %v221_v9 = vld [vmem:[%s1499_s0 + $0x10] sm:$0xff]  ;;  %v222_v10 = vld [vmem:[%s1499_s0 + $0x18] sm:$0xff]  ;;  %s1102_s19 = smov [#allocation5]  }
  0x3b   : > { %v235_v8 = vpack.c.bf16 %v220_v6, %v219_v5  ;;  %849 = vmatprep.subr.bf16.mxu0 %v247_v3  ;;  %v223_v11 = vld [vmem:[%s1499_s0 + $0x20] sm:$0xff]  ;;  %v224_v12 = vld [vmem:[%s1499_s0 + $0x28] sm:$0xff]  ;;  %v236_v14 = vpack.c.bf16 %v222_v10, %v221_v9  ;;  %v381_v16 = vld [vmem:[%s1501_s2 + $0x10] sm:$0xff]  ;;  %s1034_s25 = sshll.u32 %s1102_s19, 4  ;;  %s1035_s25 = int_to_ptr.vmem [resolvable:$false] %s1034_s25 }
  0x3c   : > { %850 = vmatpush3.bf16.msra.mxu0 %v247_v3  ;;  %v379_v13 = vld [vmem:[%s1501_s2] sm:$0xff]  ;;  %v380_v15 = vld [vmem:[%s1501_s2 + $0x8] sm:$0xff]  ;;  %v382_v17 = vld [vmem:[%s1501_s2 + $0x18] sm:$0xff]  ;;  %v237_v18 = vpack.c.bf16 %v224_v12, %v223_v11  ;;  %s1036_s29 = scalar_lea.vmem %s1035_s25, 2048 }
  0x3d   : > { %853 = vmatprep.mubr.msk.bf16.mxu0 %vm249_vm0, %v235_v8  ;;  %851 = vmatprep.subr.bf16.mxu0 %v248_v7  ;;  %v395_v19 = vpack.c.bf16 %v380_v15, %v379_v13  ;;  %v396_v20 = vpack.c.bf16 %v382_v17, %v381_v16  ;;  %v383_v21 = vld [vmem:[%s1501_s2 + $0x20] sm:$0xff]  ;;  %v384_v22 = vld [vmem:[%s1501_s2 + $0x28] sm:$0xff]  ;;  %v225_v23 = vld [vmem:[%s1499_s0 + $0x30] sm:$0xff] }
  0x3e   : > { %v226_v24 = vld [vmem:[%s1499_s0 + $0x38] sm:$0xff]  ;;  %v227_v25 = vld [vmem:[%s1499_s0 + $0x40] sm:$0xff]  ;;  %v397_v26 = vpack.c.bf16 %v384_v22, %v383_v21  ;;  %v228_v27 = vld [vmem:[%s1499_s0 + $0x48] sm:$0xff] }
  0x3f   : > { %869 = vmatprep.subr.bf16.mxu1 %v395_v19  ;;  %v385_v28 = vld [vmem:[%s1501_s2 + $0x30] sm:$0xff]  ;;  %v386_v29 = vld [vmem:[%s1501_s2 + $0x38] sm:$0xff]  ;;  %v238_v30 = vpack.c.bf16 %v226_v24, %v225_v23  ;;  %v239_v31 = vpack.c.bf16 %v228_v27, %v227_v25  ;;  %v387_v33 = vld [vmem:[%s1501_s2 + $0x40] sm:$0xff] }
  0x40   : > { %852 = vmatpush3.bf16.msra.mxu0 %v248_v7  ;;  %870 = vmatpush3.bf16.msra.mxu1 %v395_v19  ;;  %v398_v32 = vpack.c.bf16 %v386_v29, %v385_v28  ;;  %v388_v34 = vld [vmem:[%s1501_s2 + $0x48] sm:$0xff]  ;;  %v229_v35 = vld [vmem:[%s1499_s0 + $0x50] sm:$0xff]  ;;  %v230_v36 = vld [vmem:[%s1499_s0 + $0x58] sm:$0xff] }
  0x41   : > { %871 = vmatprep.subr.bf16.mxu1 %v396_v20  ;;  %v231_v37 = vld [vmem:[%s1499_s0 + $0x60] sm:$0xff]  ;;  %v399_v38 = vpack.c.bf16 %v388_v34, %v387_v33  ;;  %v232_v39 = vld [vmem:[%s1499_s0 + $0x68] sm:$0xff]  ;;  %v389_v40 = vld [vmem:[%s1501_s2 + $0x50] sm:$0xff]  ;;  %v240_v42 = vpack.c.bf16 %v230_v36, %v229_v35 }
  0x42   : > { %v390_v41 = vld [vmem:[%s1501_s2 + $0x58] sm:$0xff]  ;;  %v241_v43 = vpack.c.bf16 %v232_v39, %v231_v37  ;;  %v391_v45 = vld [vmem:[%s1501_s2 + $0x60] sm:$0xff]  ;;  %v392_v46 = vld [vmem:[%s1501_s2 + $0x68] sm:$0xff] }
  0x43   : > { %854 = vmatmul.mubr.msk.bf16.vlgmr.msra.gmra.mrb[0].mxu0 %vm249_vm0, %v236_v14  ;;  %v400_v44 = vpack.c.bf16 %v390_v41, %v389_v40  ;;  %v233_v47 = vld [vmem:[%s1499_s0 + $0x70] sm:$0xff]  ;;  %v234_v48 = vld [vmem:[%s1499_s0 + $0x78] sm:$0xff]  ;;  %v401_v49 = vpack.c.bf16 %v392_v46, %v391_v45  ;;  %v1101_v14 = vmov 0  }
  0x44   : > { %857 = vmatprep.mubr.msk.bf16.mxu0 %vm249_vm0, %v237_v18  ;;  %872 = vmatpush3.bf16.msra.mxu1 %v396_v20  ;;  %v242_v50 = vpack.c.bf16 %v234_v48, %v233_v47  ;;  %v393_v51 = vld [vmem:[%s1501_s2 + $0x70] sm:$0xff]  ;;  %v394_v52 = vld [vmem:[%s1501_s2 + $0x78] sm:$0xff] }
  0x45   : > { %873 = vmatprep.subr.bf16.mxu1 %v397_v26  ;;  %v402_v53 = vpack.c.bf16 %v394_v52, %v393_v51 }
  0x48   : > { %874 = vmatpush3.bf16.msra.mxu1 %v397_v26 }
  0x49   : > { %875 = vmatprep.subr.bf16.mxu1 %v398_v32 }
  0x4b   : > { %858 = vmatmul.mubr.msk.bf16.gmra.mrb[4].mxu0 %vm249_vm0, %v238_v30 }
  0x4c   : > { %861 = vmatprep.mubr.msk.bf16.mxu0 %vm249_vm0, %v239_v31  ;;  %876 = vmatpush3.bf16.msra.mxu1 %v398_v32 }
  0x4d   : > { %877 = vmatprep.subr.bf16.mxu1 %v399_v38 }
  0x50   : > { %878 = vmatpush3.bf16.msra.mxu1 %v399_v38 }
  0x51   : > { %879 = vmatprep.subr.bf16.mxu1 %v400_v44 }
  0x53   : > { %862 = vmatmul.mubr.msk.bf16.gmra.mrb[8].mxu0 %vm249_vm0, %v240_v42 }
  0x54   : > { %865 = vmatprep.mubr.msk.bf16.mxu0 %vm249_vm0, %v241_v43  ;;  %880 = vmatpush3.bf16.msra.mxu1 %v400_v44 }
  0x55   : > { %881 = vmatprep.subr.bf16.mxu1 %v401_v49 }
  0x58   : > { %882 = vmatpush3.bf16.msra.mxu1 %v401_v49 }
  0x59   : > { %883 = vmatprep.subr.bf16.mxu1 %v402_v53 }
  0x5b   : > { %866 = vmatmul.mubr.msk.bf16.gmra.mrb[12].mxu0 %vm249_vm0, %v242_v50 }
  0x5c   : > { %884 = vmatpush3.bf16.msra.mxu1 %v402_v53  ;;  %639 = vmatprep.mubr.bf16.mxu0 %v1101_v14 }
 0x116   : > { %v1360_v54 = vpop.f32.mrb[0].mxu0 }
 0x117   : > { %v1362_v55 = vpop.f32.mrb[1].mxu0 }
 0x118   : > { %v1364_v56 = vpop.f32.mrb[2].mxu0 }
 0x119   : > { %v372_v57 = vpack.c.bf16 %v1364_v56, %v1360_v54  ;;  %v1368_v58 = vpop.f32.mrb[3].mxu0 }
 0x11a   : > { %v371_v59 = vpack.c.bf16 %v1368_v58, %v1362_v55 }
 0x11c   : > { %885 = vmatprep.mubr.bf16.mxu1 %v371_v59 }
 0x11d   : > { %886 = vmatmul.mubr.bf16.vlgmr.msra.gmra.mrb[0].mxu1 %v372_v57 }
 0x11e   : > { %v1372_v60 = vpop.f32.mrb[4].mxu0 }
 0x11f   : > { %v1374_v61 = vpop.f32.mrb[5].mxu0 }
 0x120   : > { %v1376_v62 = vpop.f32.mrb[6].mxu0 }
 0x121   : > { %v374_v63 = vpack.c.bf16 %v1376_v62, %v1372_v60  ;;  %v1380_v0 = vpop.f32.mrb[7].mxu0 }
 0x122   : > { %v373_v1 = vpack.c.bf16 %v1380_v0, %v1374_v61 }
 0x124   : > { %889 = vmatprep.mubr.bf16.mxu1 %v373_v1 }
 0x125   : > { %890 = vmatmul.mubr.bf16.gmra.mrb[4].mxu1 %v374_v63 }
 0x126   : > { %v1384_v2 = vpop.f32.mrb[8].mxu0 }
 0x127   : > { %v1386_v3 = vpop.f32.mrb[9].mxu0 }
 0x128   : > { %v1388_v4 = vpop.f32.mrb[10].mxu0 }
 0x129   : > { %v376_v5 = vpack.c.bf16 %v1388_v4, %v1384_v2  ;;  %v1392_v6 = vpop.f32.mrb[11].mxu0 }
 0x12a   : > { %v375_v7 = vpack.c.bf16 %v1392_v6, %v1386_v3 }
 0x12c   : > { %893 = vmatprep.mubr.bf16.mxu1 %v375_v7 }
 0x12d   : > { %894 = vmatmul.mubr.bf16.gmra.mrb[8].mxu1 %v376_v5 }
 0x12e   : > { %v1396_v8 = vpop.f32.mrb[12].mxu0 }
 0x12f   : > { %v1398_v9 = vpop.f32.mrb[13].mxu0 }
 0x130   : > { %v1400_v10 = vpop.f32.mrb[14].mxu0 }
 0x131   : > { %v378_v11 = vpack.c.bf16 %v1400_v10, %v1396_v8  ;;  %v1404_v12 = vpop.f32.mrb[15].mxu0 }
 0x132   : > { %v377_v13 = vpack.c.bf16 %v1404_v12, %v1398_v9 }
 0x134   : > { %897 = vmatprep.mubr.bf16.mxu1 %v377_v13 }
 0x135   : > { %898 = vmatmul.mubr.bf16.gmra.mrb[12].mxu1 %v378_v11 }
 0x1f0   : > { %v887_v15 = vpop.f32.mrb[0].mxu1 }
 0x1f1   : > { %v437_v16 = vpop.f32.mrb[1].mxu1 }
 0x1f2   : > { %v888_v17 = vpop.f32.mrb[2].mxu1 }
 0x1f3   : > { %v440_v18 = vpop.f32.mrb[3].mxu1 }
 0x1f8   : > { %v891_v19 = vpop.f32.mrb[4].mxu1 }
 0x1f9   : > { %v502_v20 = vmax.f32 %v887_v15, %v891_v19  ;;  %v453_v21 = vpop.f32.mrb[5].mxu1 }
 0x1fa   : > { %v500_v22 = vmax.f32 %v437_v16, %v453_v21  ;;  %v892_v23 = vpop.f32.mrb[6].mxu1 }
 0x1fb   : > { %v503_v24 = vmax.f32 %v888_v17, %v892_v23  ;;  %v456_v25 = vpop.f32.mrb[7].mxu1 }
 0x1fc   : > { %v501_v26 = vmax.f32 %v440_v18, %v456_v25 }
 0x200   : > { %v895_v27 = vpop.f32.mrb[8].mxu1 }
 0x201   : > { %v506_v28 = vmax.f32 %v502_v20, %v895_v27  ;;  %v469_v29 = vpop.f32.mrb[9].mxu1 }
 0x202   : > { %v504_v30 = vmax.f32 %v500_v22, %v469_v29  ;;  %v896_v31 = vpop.f32.mrb[10].mxu1 }
 0x203   : > { %v507_v32 = vmax.f32 %v503_v24, %v896_v31  ;;  %v472_v33 = vpop.f32.mrb[11].mxu1 }
 0x204   : > { %v505_v34 = vmax.f32 %v501_v26, %v472_v33 }
 0x208   : > { %v899_v35 = vpop.f32.mrb[12].mxu1 }
 0x209   : > { %v510_v36 = vmax.f32 %v506_v28, %v899_v35  ;;  %v485_v37 = vpop.f32.mrb[13].mxu1 }
 0x20a   : > { %v508_v38 = vmax.f32 %v504_v30, %v485_v37  ;;  %v900_v39 = vpop.f32.mrb[14].mxu1 }
 0x20b   : > { %v511_v40 = vmax.f32 %v507_v32, %v900_v39  ;;  %v488_v41 = vpop.f32.mrb[15].mxu1 }
 0x20c   : > { %v509_v42 = vmax.f32 %v505_v34, %v488_v41 }
 0x20d   : > { %v513_v43 = vmax.f32 %v510_v36, %v511_v40 }
 0x20e   : > { %v512_v44 = vmax.f32 %v508_v38, %v509_v42 }
 0x210   : > { %v514_v45 = vmax.f32 %v512_v44, %v513_v43 }
 0x212   : > { %v515_v46 = vrot.slane %v514_v45, 4 }
 0x214   : > { %v516_v47 = vmax.f32 %v514_v45, %v515_v46 }
 0x216   : > { %v517_v48 = vrot.slane %v516_v47, 2 }
 0x218   : > { %v518_v49 = vmax.f32 %v516_v47, %v517_v48 }
 0x21a   : > { %v519_v50 = vrot.slane %v518_v49, 1 }
 0x21c   : > { %v520_v51 = vmax.f32 %v518_v49, %v519_v50 }
 0x21e   : > { %v534_v52 = vsub.f32 %v488_v41, %v520_v51  ;;  %v521_v53 = vsub.f32 %v437_v16, %v520_v51  ;;  %v522_v57 = vsub.f32 %v440_v18, %v520_v51  ;;  %v523_v59 = vsub.f32 %v887_v15, %v520_v51 }
 0x21f   : > { %v524_v63 = vsub.f32 %v888_v17, %v520_v51  ;;  %v525_v1 = vsub.f32 %v453_v21, %v520_v51  ;;  %v526_v5 = vsub.f32 %v456_v25, %v520_v51  ;;  %v527_v7 = vsub.f32 %v891_v19, %v520_v51 }
 0x220   : > { %v563_v11 = vmul.f32 1.442695, %v534_v52  ;;  %v537_v13 = vmul.f32 1.442695, %v521_v53  ;;  %v539_v20 = vmul.f32 1.442695, %v522_v57  ;;  %v528_v22 = vsub.f32 %v892_v23, %v520_v51 }
 0x221   : > { %v541_v24 = vmul.f32 1.442695, %v523_v59  ;;  %v529_v26 = vsub.f32 %v469_v29, %v520_v51  ;;  %v543_v28 = vmul.f32 1.442695, %v524_v63  ;;  %v545_v30 = vmul.f32 1.442695, %v525_v1 }
 0x222   : > { %952 = vpow2.f32 %v563_v11  ;;  %v547_v32 = vmul.f32 1.442695, %v526_v5  ;;  %v530_v34 = vsub.f32 %v472_v33, %v520_v51  ;;  %v531_v36 = vsub.f32 %v895_v27, %v520_v51 }
 0x223   : > { %954 = vpow2.f32 %v537_v13  ;;  %v532_v16 = vsub.f32 %v896_v31, %v520_v51  ;;  %v533_v15 = vsub.f32 %v485_v37, %v520_v51  ;;  %v535_v17 = vsub.f32 %v899_v35, %v520_v51 }
 0x224   : > { %956 = vpow2.f32 %v539_v20  ;;  %v549_v18 = vmul.f32 1.442695, %v527_v7  ;;  %v536_v19 = vsub.f32 %v900_v39, %v520_v51  ;;  %v551_v21 = vmul.f32 1.442695, %v528_v22 }
 0x225   : > { %958 = vpow2.f32 %v541_v24  ;;  %v553_v23 = vmul.f32 1.442695, %v529_v26  ;;  %v555_v25 = vmul.f32 1.442695, %v530_v34  ;;  %v557_v29 = vmul.f32 1.442695, %v531_v36 }
 0x226   : > { %960 = vpow2.f32 %v543_v28  ;;  %v559_v38 = vmul.f32 1.442695, %v532_v16  ;;  %v561_v33 = vmul.f32 1.442695, %v533_v15  ;;  %v565_v31 = vmul.f32 1.442695, %v535_v17 }
 0x227   : > { %962 = vpow2.f32 %v545_v30  ;;  %v567_v39 = vmul.f32 1.442695, %v536_v19 }
 0x228   : > { %964 = vpow2.f32 %v547_v32 }
 0x229   : > { %966 = vpow2.f32 %v549_v18 }
 0x22a   : > { %968 = vpow2.f32 %v551_v21 }
 0x22b   : > { %970 = vpow2.f32 %v553_v23 }
 0x22c   : > { %v1409_v27 = vpop.eup %952  ;;  %972 = vpow2.f32 %v555_v25 }
 0x22d   : > { %v955_v35 = vpop.eup %954  ;;  %974 = vpow2.f32 %v557_v29  ;;  %v1413_v37 = vmul.f32 %v1409_v27, %v1404_v12 }
 0x22e   : > { %v957_v40 = vpop.eup %956  ;;  %v569_v41 = vmul.f32 %v955_v35, %v1362_v55  ;;  %976 = vpow2.f32 %v559_v38 }
 0x22f   : > { %v959_v42 = vpop.eup %958  ;;  %v593_v43 = vpack.c.bf16 %v957_v40, %v955_v35  ;;  %v570_v44 = vmul.f32 %v957_v40, %v1368_v58  ;;  %978 = vpow2.f32 %v561_v33 }
 0x230   : > { %v961_v45 = vpop.eup %960  ;;  %v571_v46 = vmul.f32 %v959_v42, %v1360_v54  ;;  %980 = vpow2.f32 %v565_v31 }
 0x231   : > { %v963_v47 = vpop.eup %962  ;;  %607 = vmatprep.subr.bf16.mxu0 %v593_v43  ;;  %v585_v48 = vpack.c.bf16 %v570_v44, %v569_v41  ;;  %v594_v49 = vpack.c.bf16 %v961_v45, %v959_v42  ;;  %v572_v12 = vmul.f32 %v961_v45, %v1364_v56  ;;  %982 = vpow2.f32 %v567_v39 }
 0x232   : > { %v965_v50 = vpop.eup %964  ;;  %v573_v55 = vmul.f32 %v963_v47, %v1374_v61 }
 0x233   : > { %v967_v51 = vpop.eup %966  ;;  %608 = vmatpush1.bf16.msra.mxu0 %v585_v48  ;;  %v586_v52 = vpack.c.bf16 %v572_v12, %v571_v46  ;;  %v595_v53 = vpack.c.bf16 %v965_v50, %v963_v47  ;;  %v574_v58 = vmul.f32 %v965_v50, %v1380_v0 }
 0x234   : > { %v969_v57 = vpop.eup %968  ;;  %609 = vmatprep.subr.bf16.mxu0 %v594_v49  ;;  %v575_v54 = vmul.f32 %v967_v51, %v1372_v60 }
 0x235   : > { %v971_v59 = vpop.eup %970  ;;  %v587_v63 = vpack.c.bf16 %v574_v58, %v573_v55  ;;  %v596_v1 = vpack.c.bf16 %v969_v57, %v967_v51  ;;  %v576_v5 = vmul.f32 %v969_v57, %v1376_v62 }
 0x236   : > { %v973_v56 = vpop.eup %972  ;;  %v577_v7 = vmul.f32 %v971_v59, %v1386_v3 }
 0x237   : > { %v975_v11 = vpop.eup %974  ;;  %610 = vmatpush1.bf16.msra.mxu0 %v586_v52  ;;  %v588_v61 = vpack.c.bf16 %v576_v5, %v575_v54  ;;  %v597_v13 = vpack.c.bf16 %v973_v56, %v971_v59  ;;  %v578_v20 = vmul.f32 %v973_v56, %v1392_v6 }
 0x238   : > { %v977_v22 = vpop.eup %976  ;;  %611 = vmatprep.subr.bf16.mxu0 %v595_v53  ;;  %v579_v0 = vmul.f32 %v975_v11, %v1384_v2 }
 0x239   : > { %v979_v24 = vpop.eup %978  ;;  %v589_v60 = vpack.c.bf16 %v578_v20, %v577_v7  ;;  %v598_v26 = vpack.c.bf16 %v977_v22, %v975_v11  ;;  %v580_v28 = vmul.f32 %v977_v22, %v1388_v4  ;;  %v601_v4 = vld [vmem:[%s1238_s22] sm:$0xff] }
 0x23a   : > { %v981_v30 = vpop.eup %980  ;;  %v599_v62 = vpack.c.bf16 %v1409_v27, %v979_v24  ;;  %v581_v3 = vmul.f32 %v979_v24, %v1398_v9  ;;  %v603_v9 = vunpack.c.l.s8.bf16 %v601_v4 }
 0x23b   : > { %v983_v32 = vpop.eup %982  ;;  %612 = vmatpush1.bf16.msra.mxu0 %v587_v63  ;;  %v590_v34 = vpack.c.bf16 %v580_v28, %v579_v0  ;;  %v583_v6 = vmul.f32 %v981_v30, %v1396_v8  ;;  %v604_v8 = vunpack.c.h.s8.bf16 %v601_v4 }
 0x23c   : > { %613 = vmatprep.subr.bf16.mxu0 %v596_v1  ;;  %v591_v36 = vpack.c.bf16 %v1413_v37, %v581_v3  ;;  %v600_v2 = vpack.c.bf16 %v983_v32, %v981_v30  ;;  %v584_v16 = vmul.f32 %v983_v32, %v1400_v10  ;;  %v602_v10 = vld [vmem:[%s1238_s22 + $0x8] sm:$0xff]  ;;  %s807_s22 = sshll.u32 %s1234_s13, 6 }
 0x23d   : > { %v605_v17 = vunpack.c.l.s8.bf16 %v602_v10  ;;  %v606_v18 = vunpack.c.h.s8.bf16 %v602_v10  ;;  %s1438_s9 = scalar_lea.vmem [#allocation5], %s807_s22 }
 0x23e   : > { %v592_v15 = vpack.c.bf16 %v584_v16, %v583_v6  ;;  %s726_s20 = sshll.u32 %s1438_s9, 4  ;;  %s1453_s20 = int_to_ptr.vmem [resolvable:$true] %s726_s20 }
 0x23f   : > { %614 = vmatpush1.bf16.msra.mxu0 %v588_v61  ;;  %s1030_s23 = scalar_lea.vmem %s1453_s20, 1024  ;;  %p1037_p8 = scmp.lt.s32.totalorder %s1453_s20, %s1035_s25 }
 0x240   : > { %615 = vmatprep.subr.bf16.mxu0 %v597_v13  ;;  %p1031_p6 = scmp.ne.s32.totalorder %s1453_s20, %s1030_s23  ;;  %p1038_p10 = scmp.lt.s32.totalorder %s1036_s29, %s1030_s23 }
 0x242   : > { %p1032_p12 = pnand %p1031_p6, %p1510_p11  ;;  %p1039_p0 = por %p1038_p10, %p1037_p8 }
 0x243   : > { %616 = vmatpush1.bf16.msra.mxu0 %v589_v60 }
 0x244   : > { %617 = vmatprep.subr.bf16.mxu0 %v598_v26  ;;  %p1033_p13 = pneg %p1032_p12 }
 0x246   : > { %p1040_p2 = pnand %p1039_p0, %p1033_p13 }
 0x247   : > { %618 = vmatpush1.bf16.msra.mxu0 %v590_v34 }
 0x248   : > { %619 = vmatprep.subr.bf16.mxu0 %v599_v62 }
 0x24b   : > { %620 = vmatpush1.bf16.msra.mxu0 %v591_v36 }
 0x24c   : > { %621 = vmatprep.subr.bf16.mxu0 %v600_v2 }
 0x24f   : > { %622 = vmatpush1.bf16.msra.mxu0 %v592_v15 }
 0x252   : > { %640 = vmatmul.mubr.bf16.vlgmr.msra.gmra.mrb[16].mxu0 %v603_v9 }
 0x253   : > { %649 = vmatprep.mubr.bf16.mxu0 %v1101_v14 }
 0x25a   : > { %650 = vmatmul.mubr.bf16.gmra.mrb[20].mxu0 %v604_v8 }
 0x25b   : > { %659 = vmatprep.mubr.bf16.mxu0 %v1101_v14 }
 0x262   : > { %660 = vmatmul.mubr.bf16.gmra.mrb[24].mxu0 %v605_v17 }
 0x263   : > { %669 = vmatprep.mubr.bf16.mxu0 %v1101_v14 }
 0x26a   : > { %670 = vmatmul.mubr.bf16.gmra.mrb[28].mxu0 %v606_v18 }
 0x325   : > { %v641_v19 = vpop.f32.mrb[16].mxu0 }
 0x326   : > { %v643_v21 = vpop.f32.mrb[17].mxu0 }
 0x327   : > { %v680_v23 = vadd.f32 1e-16, %v643_v21  ;;  %v645_v25 = vpop.f32.mrb[18].mxu0 }
 0x328   : > { %v647_v29 = vpop.f32.mrb[19].mxu0 }
 0x329   : > { %984 = vrcp.f32 %v680_v23  ;;  %v681_v38 = vadd.f32 1e-16, %v647_v29 }
 0x32b   : > { %986 = vrcp.f32 %v681_v38 }
 0x32d   : > { %v651_v33 = vpop.f32.mrb[20].mxu0 }
 0x32e   : > { %v653_v27 = vpop.f32.mrb[21].mxu0 }
 0x32f   : > { %v682_v31 = vadd.f32 1e-16, %v653_v27  ;;  %v655_v35 = vpop.f32.mrb[22].mxu0 }
 0x330   : > { %v657_v37 = vpop.f32.mrb[23].mxu0 }
 0x331   : > { %988 = vrcp.f32 %v682_v31  ;;  %v683_v39 = vadd.f32 1e-16, %v657_v37 }
 0x333   : > { %v985_v40 = vpop.eup %984  ;;  %990 = vrcp.f32 %v683_v39 }
 0x334   : > { %v696_v14 = vmul.f32 %v985_v40, %v641_v19 }
 0x335   : > { %v987_v41 = vpop.eup %986  ;;  %v661_v42 = vpop.f32.mrb[24].mxu0 }
 0x336   : > { %704 = vst [vmem:[%s1438_s9] sm:$0xff] %v696_v14  ;;  %v697_v43 = vmul.f32 %v987_v41, %v645_v25  ;;  %v663_v44 = vpop.f32.mrb[25].mxu0 }
 0x337   : > { %v684_v45 = vadd.f32 1e-16, %v663_v44  ;;  %v665_v46 = vpop.f32.mrb[26].mxu0 }
 0x338   : > { %705 = vst [vmem:[%s1438_s9 + $0x8] sm:$0xff] %v697_v43  ;;  %v667_v47 = vpop.f32.mrb[27].mxu0 }
 0x339   : > { %992 = vrcp.f32 %v684_v45  ;;  %v685_v48 = vadd.f32 1e-16, %v667_v47 }
 0x33b   : > { %v989_v49 = vpop.eup %988  ;;  %994 = vrcp.f32 %v685_v48 }
 0x33c   : > { %v698_v12 = vmul.f32 %v989_v49, %v651_v33 }
 0x33d   : > { %v991_v50 = vpop.eup %990  ;;  %v671_v55 = vpop.f32.mrb[28].mxu0 }
 0x33e   : > { %706 = vst [vmem:[%s1438_s9 + $0x10] sm:$0xff] %v698_v12  ;;  %v699_v51 = vmul.f32 %v991_v50, %v655_v35  ;;  %v673_v52 = vpop.f32.mrb[29].mxu0 }
 0x33f   : > { %v686_v53 = vadd.f32 1e-16, %v673_v52  ;;  %v675_v58 = vpop.f32.mrb[30].mxu0 }
 0x340   : > { %707 = vst [vmem:[%s1438_s9 + $0x18] sm:$0xff] %v699_v51  ;;  %v677_v57 = vpop.f32.mrb[31].mxu0 }
 0x341   : > { %996 = vrcp.f32 %v686_v53  ;;  %v687_v54 = vadd.f32 1e-16, %v677_v57 }
 0x343   : > { %v993_v59 = vpop.eup %992  ;;  %998 = vrcp.f32 %v687_v54 }
 0x344   : > { %v700_v63 = vmul.f32 %v993_v59, %v661_v42 }
 0x345   : > { %v995_v1 = vpop.eup %994 }
 0x346   : > { %708 = vst [vmem:[%s1438_s9 + $0x20] sm:$0xff] %v700_v63  ;;  %v701_v5 = vmul.f32 %v995_v1, %v665_v46 }
 0x348   : > { %709 = vst [vmem:[%s1438_s9 + $0x28] sm:$0xff] %v701_v5 }
 0x34b   : > { %v997_v56 = vpop.eup %996 }
 0x34c   : > { %v702_v7 = vmul.f32 %v997_v56, %v671_v55 }
 0x34d   : > { %v999_v11 = vpop.eup %998 }
 0x34e   : > { %710 = vst [vmem:[%s1438_s9 + $0x30] sm:$0xff] %v702_v7  ;;  %v703_v61 = vmul.f32 %v999_v11, %v675_v58 }
 0x350   : > { %711 = vst [vmem:[%s1438_s9 + $0x38] sm:$0xff] %v703_v61 }
 0x351   : > { %1043 = shalt.err (!%p1040_p2)
}
 0x352   : > { %s1044_s30 = scalar_lea.hbm %s1451_s11, 1024  ;;  %s1048_s6 = scalar_lea.hbm %s1503_s4, 2048 }
 0x353   : > { %p1045_p4 = scmp.ne.s32.totalorder %s1451_s11, %s1044_s30  ;;  %p1049_p9 = scmp.lt.u32.totalorder %s1451_s11, %s1503_s4 }
 0x354   : > { %p1050_p1 = scmp.lt.u32.totalorder %s1048_s6, %s1044_s30  ;;  %p1052_p6 = scmp.lt.u32.totalorder %s1044_s30, %s1451_s11 }
 0x355   : > { %p1046_p5 = pnand %p1045_p4, %p1510_p11 }
 0x356   : > { %p1051_p3 = por %p1050_p1, %p1049_p9 }
 0x357   : > { %p1047_p7 = pneg %p1046_p5 }
 0x358   : > { %p1053_p12 = por %p1052_p6, %p1051_p3 }
 0x35a   : > { %p1054_p13 = pnand %p1053_p12, %p1047_p7 }
 0x35c   : > { %1057 = shalt.err (!%p1054_p13)
}
 0x35d   : > { %s1103_s9 = smov 128   ;;  %s1104_s14 = smov 8  }
 0x35e   : > { %903 = dma.vmem_to_hbm [thread:$0]  (%p1510_p11), %s1453_s20, 1024, %s1451_s11, %s713_s12, %s1103_s9, %s1103_s9, %s1104_s14  }
 0x35f PF: > { %s741_s8 = sand.u32 1, %s1084_s15   ;;  %p1511_p8 = scmp.ne.s32.totalorder %s1508_s28, 0 }
 0x360   : > { %p1512_p10 = scmp.ge.s32.totalorder %s1096_s18, 2  ;;  %s742_s10 = scalar_lea.sflag [#allocation4], %s741_s8 }
 0x362   : > { %p910_p0 = pnand %p1512_p10, %p1511_p8 }
 0x364   : > { %1079 = dma.done.wait (!%p910_p0), %s742_s10, 1024  }
 0x365   : > { %1081 = vsyncadd (!%p910_p0), %s742_s10, 4294966272  ;;  %p17_p2 = scmp.ge.s32.totalorder %s1155_s21, 4   ;;  %s1513_s15 = smov %s1088_s16 }
 0x366   : > { %s1514_s16 = smov %s1092_s17  ;;  %s1515_s17 = smov %s1167_s24 }
 0x367   : > { %s1516_s18 = smov %s1155_s21  ;;  %19 = sbr.rel (!%p17_p2) target bundleno = 5 (0x5), region = 81 }
 0x36e   :  { %747 = vsyncpa [#allocation3], 1 }
 0x36f   :  { %749 = vsyncpa [#allocation3 + $0x1], 1 }
 0x370   :  { %750 = vsyncpa [#allocation4], 1 }
 0x371   :  { %752 = vsyncpa [#allocation4 + $0x1], 1 }

</bundles_post_ra>
